<compile_context>
chip_gen: v7x
topology: tpu7x:2x2x1
jax: 0.10.0
libtpu: 0.0.40
codegen_flags: <defaults>
</compile_context>

<pallas_src>
import functools

import jax
import jax.numpy as jnp
from jax.experimental import pallas as pl
from jax.experimental.pallas import tpu as pltpu


_MAX_TP = 4096  # pixels (lanes) per grid step; multiple of (8, 128)


# ----------------------------- Pallas kernel ------------------------------ #
def _fused_freq_conv_kernel(xr_ref, xi_ref, w1r_ref, w1i_ref, w2r_ref, w2i_ref,
                            or_ref, oi_ref):
    """conv2(relu(conv1([real; imag]))) for 1x1 convs, channels-first layout.

    xr_ref / xi_ref : (C, TP)        real / imag frequency-domain activations
    w1r_ref/w1i_ref : (2*Cout, C)    conv1 weight, split along input channels
    w2r_ref/w2i_ref : (Cout, 2*Cout) conv2 weight, split along output channels
    or_ref / oi_ref : (Cout, TP)     real / imag outputs
    """
    xr = xr_ref[...]
    xi = xi_ref[...]
    # conv1 on the implicit [real; imag] channel concat (done via split weights).
    h = (jnp.dot(w1r_ref[...], xr, preferred_element_type=jnp.float32)
         + jnp.dot(w1i_ref[...], xi, preferred_element_type=jnp.float32))
    h = jnp.maximum(h, 0.0)  # ReLU, f32 (matches torch inplace ReLU math)
    # conv2, producing the real / imag output halves directly.
    or_ref[...] = jnp.dot(w2r_ref[...], h,
                          preferred_element_type=jnp.float32).astype(or_ref.dtype)
    oi_ref[...] = jnp.dot(w2i_ref[...], h,
                          preferred_element_type=jnp.float32).astype(oi_ref.dtype)


def _fused_freq_conv(yr, yi, w1m, w2m):
    """yr, yi: (N, C, P) f32; w1m: (2*Cout, 2*C); w2m: (2*Cout, 2*Cout).

    Returns (out_real, out_imag), each (N, Cout, P) f32.
    """
    N, C, P = yr.shape
    cout2 = w1m.shape[0]
    cout = cout2 // 2

    # Split weights instead of concatenating / chunking the activations.
    w1r = w1m[:, :C]        # acts on real input channels
    w1i = w1m[:, C:]        # acts on imag input channels
    w2r = w2m[:cout, :]     # produces real output channels
    w2i = w2m[cout:, :]     # produces imag output channels

    # Pixel tiling: one big lane-dense tile per step.  No full-array padding;
    # per-pixel independence means a ragged (masked) last tile is safe.
    tp = P if P <= _MAX_TP else _MAX_TP
    n_ptiles = pl.cdiv(P, tp)

    out_r, out_i = pl.pallas_call(
        _fused_freq_conv_kernel,
        out_shape=(jax.ShapeDtypeStruct((N, cout, P), jnp.float32),
                   jax.ShapeDtypeStruct((N, cout, P), jnp.float32)),
        grid_spec=pltpu.PrefetchScalarGridSpec(
            num_scalar_prefetch=0,
            grid=(N, n_ptiles),
            in_specs=[
                pl.BlockSpec((None, C, tp), lambda n, p: (n, 0, p)),
                pl.BlockSpec((None, C, tp), lambda n, p: (n, 0, p)),
                pl.BlockSpec((cout2, C), lambda n, p: (0, 0)),
                pl.BlockSpec((cout2, C), lambda n, p: (0, 0)),
                pl.BlockSpec((cout, cout2), lambda n, p: (0, 0)),
                pl.BlockSpec((cout, cout2), lambda n, p: (0, 0)),
            ],
            out_specs=[
                pl.BlockSpec((None, cout, tp), lambda n, p: (n, 0, p)),
                pl.BlockSpec((None, cout, tp), lambda n, p: (n, 0, p)),
            ],
        ),
        compiler_params=pltpu.CompilerParams(
            dimension_semantics=("parallel", "parallel")),
    )(yr, yi, w1r, w1i, w2r, w2i)
    return out_r, out_i


# ------------------------------ Module wrapper ----------------------------- #
def resblock_fft_bench(x, w1, w2, norm="backward"):
    """x: (N, C, H, W) f32; w1: (2*Cout, 2*C, 1, 1); w2: (2*Cout, 2*Cout, 1, 1)."""
    N, C, H, W = x.shape
    Wf = W // 2 + 1
    cout = w2.shape[0] // 2

    # TODO(synk): rfft2 / irfft2 have no Pallas equivalent; they stay in XLA.
    y = jnp.fft.rfft2(x, axes=(-2, -1), norm=norm)        # (N, C, H, Wf) complex64
    # Channels stay in position 1; only the trailing spatial dims are flattened
    # (contiguous reshape, no transpose / no concat buffer).
    yr = jnp.real(y).reshape(N, C, H * Wf)
    yi = jnp.imag(y).reshape(N, C, H * Wf)

    out_r, out_i = _fused_freq_conv(yr, yi, w1[:, :, 0, 0], w2[:, :, 0, 0])

    yc = jax.lax.complex(out_r.reshape(N, cout, H, Wf),
                         out_i.reshape(N, cout, H, Wf))
    return jnp.fft.irfft2(yc, s=(H, W), axes=(-2, -1), norm=norm)


# Pure-JAX reference (for correctness check of the Pallas hot path).
def _reference(x, w1, w2, norm="backward"):
    N, C, H, W = x.shape
    y = jnp.fft.rfft2(x, axes=(-2, -1), norm=norm)
    y_f = jnp.concatenate([jnp.real(y), jnp.imag(y)], axis=1)
    h = jnp.einsum("oc,nchw->nohw", w1[:, :, 0, 0], y_f)
    h = jnp.maximum(h, 0.0)
    o = jnp.einsum("oc,nchw->nohw", w2[:, :, 0, 0], h)
    yr, yi = jnp.split(o, 2, axis=1)
    yc = jax.lax.complex(yr, yi)
    return jnp.fft.irfft2(yc, s=(H, W), axes=(-2, -1), norm=norm)


if __name__ == "__main__":
    key = jax.random.PRNGKey(0)
    k_x, k_w1, k_w2 = jax.random.split(key, 3)

    # Small shapes: batch=2, in_channel=out_channel=4, spatial 16x16.
    N, C, H, W = 2, 4, 16, 16
    in_channel = out_channel = C

    x = jax.random.normal(k_x, (N, C, H, W), dtype=jnp.float32)

    # Deterministic synthetic weights (PyTorch shapes: (out*2, in*2, 1, 1)).
    fan_in1 = in_channel * 2
    fan_in2 = out_channel * 2
    bound1 = 1.0 / jnp.sqrt(fan_in1)
    bound2 = 1.0 / jnp.sqrt(fan_in2)
    w1 = jax.random.uniform(k_w1, (out_channel * 2, in_channel * 2, 1, 1),
                            minval=-bound1, maxval=bound1, dtype=jnp.float32)
    w2 = jax.random.uniform(k_w2, (out_channel * 2, out_channel * 2, 1, 1),
                            minval=-bound2, maxval=bound2, dtype=jnp.float32)

    fn = jax.jit(functools.partial(resblock_fft_bench, norm="backward"))
    out = fn(x, w1, w2)
    jax.block_until_ready(out)

    ref = _reference(x, w1, w2, norm="backward")
    assert out.shape == (N, out_channel, H, W)
    assert jnp.allclose(out, ref, atol=1e-4, rtol=1e-4), "mismatch vs reference"

    print("KERNEL_OK")
</pallas_src>

<mosaic_0001>
module attributes {stable_mosaic.version = 11 : i64} {
  func.func @_fused_freq_conv_kernel(%arg0: i32, %arg1: i32, %arg2: memref<1x4x144xf32, #tpu.memory_space<vmem>>, %arg3: memref<1x4x144xf32, #tpu.memory_space<vmem>>, %arg4: memref<8x4xf32, #tpu.memory_space<vmem>>, %arg5: memref<8x4xf32, #tpu.memory_space<vmem>>, %arg6: memref<4x8xf32, #tpu.memory_space<vmem>>, %arg7: memref<4x8xf32, #tpu.memory_space<vmem>>, %arg8: memref<1x4x144xf32, #tpu.memory_space<vmem>>, %arg9: memref<1x4x144xf32, #tpu.memory_space<vmem>>) attributes {dimension_semantics = [#tpu.dimension_semantics<parallel>, #tpu.dimension_semantics<parallel>], iteration_bounds = array<i64: 2, 1>, scalar_prefetch = 0 : i64, scratch_operands = 0 : i64, tpu.core_type = #tpu.core_type<tc>, window_params = [{transform_indices = @transform_0, window_bounds = array<i64: 1, 4, 144>}, {transform_indices = @transform_1, window_bounds = array<i64: 1, 4, 144>}, {pipeline_mode = #tpu.pipeline_mode<synchronous>, transform_indices = @transform_2, window_bounds = array<i64: 8, 4>}, {pipeline_mode = #tpu.pipeline_mode<synchronous>, transform_indices = @transform_3, window_bounds = array<i64: 8, 4>}, {pipeline_mode = #tpu.pipeline_mode<synchronous>, transform_indices = @transform_4, window_bounds = array<i64: 4, 8>}, {pipeline_mode = #tpu.pipeline_mode<synchronous>, transform_indices = @transform_5, window_bounds = array<i64: 4, 8>}, {transform_indices = @transform_6, window_bounds = array<i64: 1, 4, 144>}, {transform_indices = @transform_7, window_bounds = array<i64: 1, 4, 144>}]} {
    %c0 = arith.constant 0 : index
    %c0_0 = arith.constant 0 : index
    %c0_1 = arith.constant 0 : index
    %0 = vector.load %arg2[%c0, %c0_0, %c0_1] : memref<1x4x144xf32, #tpu.memory_space<vmem>>, vector<1x4x144xf32>
    %1 = vector.shape_cast %0 : vector<1x4x144xf32> to vector<4x144xf32>
    %c0_2 = arith.constant 0 : index
    %c0_3 = arith.constant 0 : index
    %c0_4 = arith.constant 0 : index
    %2 = vector.load %arg3[%c0_2, %c0_3, %c0_4] : memref<1x4x144xf32, #tpu.memory_space<vmem>>, vector<1x4x144xf32>
    %3 = vector.shape_cast %2 : vector<1x4x144xf32> to vector<4x144xf32>
    %c0_5 = arith.constant 0 : index
    %c0_6 = arith.constant 0 : index
    %4 = vector.load %arg4[%c0_5, %c0_6] : memref<8x4xf32, #tpu.memory_space<vmem>>, vector<8x4xf32>
    %cst = arith.constant dense<0.000000e+00> : vector<8x144xf32>
    %5 = tpu.matmul %4, %1, %cst {dimension_numbers = #tpu.dot_dimension_numbers<[1], [0], [0], [1], [0, 0, 1, 1], [], []>} : vector<8x4xf32>, vector<4x144xf32>, vector<8x144xf32> -> vector<8x144xf32>
    %c0_7 = arith.constant 0 : index
    %c0_8 = arith.constant 0 : index
    %6 = vector.load %arg5[%c0_7, %c0_8] : memref<8x4xf32, #tpu.memory_space<vmem>>, vector<8x4xf32>
    %cst_9 = arith.constant dense<0.000000e+00> : vector<8x144xf32>
    %7 = tpu.matmul %6, %3, %cst_9 {dimension_numbers = #tpu.dot_dimension_numbers<[1], [0], [0], [1], [0, 0, 1, 1], [], []>} : vector<8x4xf32>, vector<4x144xf32>, vector<8x144xf32> -> vector<8x144xf32>
    %8 = arith.addf %5, %7 : vector<8x144xf32>
    %cst_10 = arith.constant 0.000000e+00 : f32
    %9 = vector.broadcast %cst_10 : f32 to vector<8x144xf32>
    %10 = arith.maximumf %8, %9 : vector<8x144xf32>
    %c0_11 = arith.constant 0 : index
    %c0_12 = arith.constant 0 : index
    %11 = vector.load %arg6[%c0_11, %c0_12] : memref<4x8xf32, #tpu.memory_space<vmem>>, vector<4x8xf32>
    %cst_13 = arith.constant dense<0.000000e+00> : vector<4x144xf32>
    %12 = tpu.matmul %11, %10, %cst_13 {dimension_numbers = #tpu.dot_dimension_numbers<[1], [0], [0], [1], [0, 0, 1, 1], [], []>} : vector<4x8xf32>, vector<8x144xf32>, vector<4x144xf32> -> vector<4x144xf32>
    %c0_14 = arith.constant 0 : index
    %c0_15 = arith.constant 0 : index
    %c0_16 = arith.constant 0 : index
    %13 = vector.load %arg8[%c0_14, %c0_15, %c0_16] : memref<1x4x144xf32, #tpu.memory_space<vmem>>, vector<1x4x144xf32>
    %14 = vector.shape_cast %13 : vector<1x4x144xf32> to vector<4x144xf32>
    %15 = vector.shape_cast %12 : vector<4x144xf32> to vector<1x4x144xf32>
    tpu.vector_store %arg8[%c0_14, %c0_15, %c0_16], %15 {strides = array<i32>} : memref<1x4x144xf32, #tpu.memory_space<vmem>>, vector<1x4x144xf32>,
    %c0_17 = arith.constant 0 : index
    %c0_18 = arith.constant 0 : index
    %16 = vector.load %arg7[%c0_17, %c0_18] : memref<4x8xf32, #tpu.memory_space<vmem>>, vector<4x8xf32>
    %cst_19 = arith.constant dense<0.000000e+00> : vector<4x144xf32>
    %17 = tpu.matmul %16, %10, %cst_19 {dimension_numbers = #tpu.dot_dimension_numbers<[1], [0], [0], [1], [0, 0, 1, 1], [], []>} : vector<4x8xf32>, vector<8x144xf32>, vector<4x144xf32> -> vector<4x144xf32>
    %c0_20 = arith.constant 0 : index
    %c0_21 = arith.constant 0 : index
    %c0_22 = arith.constant 0 : index
    %18 = vector.load %arg9[%c0_20, %c0_21, %c0_22] : memref<1x4x144xf32, #tpu.memory_space<vmem>>, vector<1x4x144xf32>
    %19 = vector.shape_cast %18 : vector<1x4x144xf32> to vector<4x144xf32>
    %20 = vector.shape_cast %17 : vector<4x144xf32> to vector<1x4x144xf32>
    tpu.vector_store %arg9[%c0_20, %c0_21, %c0_22], %20 {strides = array<i32>} : memref<1x4x144xf32, #tpu.memory_space<vmem>>, vector<1x4x144xf32>,
    return
  }
  func.func @transform_0(%arg0: i32, %arg1: i32) -> (i32, i32, i32) {
    %c0_i32 = arith.constant 0 : i32
    %c0_i32_0 = arith.constant 0 : i32
    return %arg0, %c0_i32, %arg1 : i32, i32, i32
  }
  func.func @transform_1(%arg0: i32, %arg1: i32) -> (i32, i32, i32) {
    %c0_i32 = arith.constant 0 : i32
    %c0_i32_0 = arith.constant 0 : i32
    return %arg0, %c0_i32, %arg1 : i32, i32, i32
  }
  func.func @transform_2(%arg0: i32, %arg1: i32) -> (i32, i32) {
    %c0_i32 = arith.constant 0 : i32
    %c0_i32_0 = arith.constant 0 : i32
    %c0_i32_1 = arith.constant 0 : i32
    return %c0_i32, %c0_i32_0 : i32, i32
  }
  func.func @transform_3(%arg0: i32, %arg1: i32) -> (i32, i32) {
    %c0_i32 = arith.constant 0 : i32
    %c0_i32_0 = arith.constant 0 : i32
    %c0_i32_1 = arith.constant 0 : i32
    return %c0_i32, %c0_i32_0 : i32, i32
  }
  func.func @transform_4(%arg0: i32, %arg1: i32) -> (i32, i32) {
    %c0_i32 = arith.constant 0 : i32
    %c0_i32_0 = arith.constant 0 : i32
    %c0_i32_1 = arith.constant 0 : i32
    return %c0_i32, %c0_i32_0 : i32, i32
  }
  func.func @transform_5(%arg0: i32, %arg1: i32) -> (i32, i32) {
    %c0_i32 = arith.constant 0 : i32
    %c0_i32_0 = arith.constant 0 : i32
    %c0_i32_1 = arith.constant 0 : i32
    return %c0_i32, %c0_i32_0 : i32, i32
  }
  func.func @transform_6(%arg0: i32, %arg1: i32) -> (i32, i32, i32) {
    %c0_i32 = arith.constant 0 : i32
    %c0_i32_0 = arith.constant 0 : i32
    return %arg0, %c0_i32, %arg1 : i32, i32, i32
  }
  func.func @transform_7(%arg0: i32, %arg1: i32) -> (i32, i32, i32) {
    %c0_i32 = arith.constant 0 : i32
    %c0_i32_0 = arith.constant 0 : i32
    return %arg0, %c0_i32, %arg1 : i32, i32, i32
  }
}

</mosaic_0001>

<bundles_post_ra>
// kernel: reverse.0
= control target key start
LH: loop header
LB: loop body
LE: loop exit
PB: predicated region body
PF: predicated region fallthrough
CT: control target
= control target key end

     0   :  { %v71_v3 = vlaneseq  ;;  %v64_v9 = vld [vmem:[#allocation0 + $0x7] ss:$-1 sm:$0xff]  ;;  %v78_v12 = vld [vmem:[#allocation0 + $0x17] ss:$-1 sm:$0xff]  ;;  %s329_s0 = inlined_call_operand.vmem [shape: f32[2,4,16,7], index: 0, kind: input, shape index: {}]   ;;  %s330_s1 = inlined_call_operand.vmem [shape: f32[2,4,16,7], index: 1, kind: output, shape index: {}]  }
   0x1   :  { %v44_v0 = vld [vmem:[%s329_s0] sm:$0xff]  ;;  %v46_v1 = vld [vmem:[%s329_s0 + $0x8] sm:$0xff]  ;;  %v48_v2 = vld [vmem:[%s329_s0 + $0x10] sm:$0xff]  ;;  %v65_v10 = vrot.slane %v64_v9, 1  ;;  %v79_v14 = vrot.slane %v78_v12, 1 }
   0x2   :  { %45 = vst [vmem:[#allocation0 + $0x8] sm:$0xff] %v44_v0  ;;  %47 = vst [vmem:[#allocation0 + $0x18] sm:$0xff] %v46_v1  ;;  %v50_v4 = vld [vmem:[%s329_s0 + $0x18] sm:$0xff]  ;;  %v52_v5 = vld [vmem:[%s329_s0 + $0x20] sm:$0xff]  ;;  %v72_v11 = vshrl.u32 %v71_v3, 7 }
   0x3   :  { %49 = vst [vmem:[#allocation0 + $0x28] sm:$0xff] %v48_v2  ;;  %v54_v6 = vld [vmem:[%s329_s0 + $0x28] sm:$0xff]  ;;  %51 = vst [vmem:[#allocation0 + $0x38] sm:$0xff] %v50_v4  ;;  %v56_v7 = vld [vmem:[%s329_s0 + $0x30] sm:$0xff] }
   0x4   :  { %53 = vst [vmem:[#allocation0 + $0x48] sm:$0xff] %v52_v5  ;;  %55 = vst [vmem:[#allocation0 + $0x58] sm:$0xff] %v54_v6  ;;  %v58_v8 = vld [vmem:[%s329_s0 + $0x38] sm:$0xff]  ;;  %v92_v13 = vld [vmem:[#allocation0 + $0x27] ss:$-1 sm:$0xff]  ;;  %vm73_vm0 = vcmp.lt.s32.totalorder %v72_v11, 7 }
   0x5   :  { %57 = vst [vmem:[#allocation0 + $0x68] sm:$0xff] %v56_v7  ;;  %59 = vst [vmem:[#allocation0 + $0x78] sm:$0xff] %v58_v8  ;;  %v93_v15 = vrot.slane %v92_v13, 1  ;;  %v106_v16 = vld [vmem:[#allocation0 + $0x37] ss:$-1 sm:$0xff] }
   0x6   :  { %66 = vst [vmem:[#allocation1] sm:$0xff] %v65_v10  ;;  %v107_v17 = vrot.slane %v106_v16, 1  ;;  %v120_v18 = vld [vmem:[#allocation0 + $0x47] ss:$-1 sm:$0xff]  ;;  %v134_v19 = vld [vmem:[#allocation0 + $0x57] ss:$-1 sm:$0xff] }
   0x7   :  { %80 = vst [vmem:[#allocation1 + $0x8] sm:$0xff] %v79_v14  ;;  %94 = vst [vmem:[#allocation1 + $0x10] sm:$0xff] %v93_v15  ;;  %v121_v20 = vrot.slane %v120_v18, 1  ;;  %v135_v21 = vrot.slane %v134_v19, 1  ;;  %v148_v22 = vld [vmem:[#allocation0 + $0x67] ss:$-1 sm:$0xff] }
   0x8   :  { %v162_v23 = vld [vmem:[#allocation0 + $0x77] ss:$-1 sm:$0xff]  ;;  %108 = vst [vmem:[#allocation1 + $0x18] sm:$0xff] %v107_v17  ;;  %v149_v24 = vrot.slane %v148_v22, 1 }
   0x9   :  { %v163_v25 = vrot.slane %v162_v23, 1  ;;  %v69_v26 = vld [vmem:[#allocation0 + $0xf] ss:$-1 sm:$0xff]  ;;  %v83_v27 = vld [vmem:[#allocation0 + $0x1f] ss:$-1 sm:$0xff]  ;;  %122 = vst [vmem:[#allocation1 + $0x20] sm:$0xff] %v121_v20 }
   0xa   :  { %v97_v28 = vld [vmem:[#allocation0 + $0x2f] ss:$-1 sm:$0xff]  ;;  %136 = vst [vmem:[#allocation1 + $0x28] sm:$0xff] %v135_v21  ;;  %v70_v29 = vrot.slane %v69_v26, 1  ;;  %v84_v30 = vrot.slane %v83_v27, 1  ;;  %150 = vst [vmem:[#allocation1 + $0x30] sm:$0xff] %v149_v24 }
   0xb   :  { %v98_v31 = vrot.slane %v97_v28, 1  ;;  %v111_v32 = vld [vmem:[#allocation0 + $0x3f] ss:$-1 sm:$0xff]  ;;  %164 = vst [vmem:[#allocation1 + $0x38] sm:$0xff] %v163_v25  ;;  %v125_v34 = vld [vmem:[#allocation0 + $0x4f] ss:$-1 sm:$0xff] }
   0xc   :  { %v112_v33 = vrot.slane %v111_v32, 1  ;;  %v139_v35 = vld [vmem:[#allocation0 + $0x5f] ss:$-1 sm:$0xff]  ;;  %74 = vst.msk [vmem:[#allocation1] sm:$0xff] %vm73_vm0, %v70_v29  ;;  %88 = vst.msk [vmem:[#allocation1 + $0x8] sm:$0xff] %vm73_vm0, %v84_v30  ;;  %v126_v36 = vrot.slane %v125_v34, 1 }
   0xd   :  { %102 = vst.msk [vmem:[#allocation1 + $0x10] sm:$0xff] %vm73_vm0, %v98_v31  ;;  %v140_v37 = vrot.slane %v139_v35, 1  ;;  %v153_v38 = vld [vmem:[#allocation0 + $0x6f] ss:$-1 sm:$0xff]  ;;  %v167_v39 = vld [vmem:[#allocation0 + $0x7f] ss:$-1 sm:$0xff] }
   0xe   :  { %116 = vst.msk [vmem:[#allocation1 + $0x18] sm:$0xff] %vm73_vm0, %v112_v33  ;;  %v154_v40 = vrot.slane %v153_v38, 1  ;;  %v168_v41 = vrot.slane %v167_v39, 1  ;;  %130 = vst.msk [vmem:[#allocation1 + $0x20] sm:$0xff] %vm73_vm0, %v126_v36 }
   0xf   :  { %144 = vst.msk [vmem:[#allocation1 + $0x28] sm:$0xff] %vm73_vm0, %v140_v37 }
  0x10   :  { %158 = vst.msk [vmem:[#allocation1 + $0x30] sm:$0xff] %vm73_vm0, %v154_v40  ;;  %172 = vst.msk [vmem:[#allocation1 + $0x38] sm:$0xff] %vm73_vm0, %v168_v41 }
  0x13   :  { %v214_v42 = vld [vmem:[#allocation1] sm:$0xff]  ;;  %v216_v43 = vld [vmem:[#allocation1 + $0x8] sm:$0xff] }
  0x14   :  { %v218_v44 = vld [vmem:[#allocation1 + $0x10] sm:$0xff]  ;;  %215 = vst [vmem:[%s330_s1] sm:$0xff] %v214_v42  ;;  %217 = vst [vmem:[%s330_s1 + $0x8] sm:$0xff] %v216_v43 }
  0x15   :  { %219 = vst [vmem:[%s330_s1 + $0x10] sm:$0xff] %v218_v44  ;;  %v220_v45 = vld [vmem:[#allocation1 + $0x18] sm:$0xff]  ;;  %v222_v46 = vld [vmem:[#allocation1 + $0x20] sm:$0xff] }
  0x16   :  { %221 = vst [vmem:[%s330_s1 + $0x18] sm:$0xff] %v220_v45  ;;  %v224_v47 = vld [vmem:[#allocation1 + $0x28] sm:$0xff]  ;;  %223 = vst [vmem:[%s330_s1 + $0x20] sm:$0xff] %v222_v46 }
  0x17   :  { %225 = vst [vmem:[%s330_s1 + $0x28] sm:$0xff] %v224_v47  ;;  %v226_v48 = vld [vmem:[#allocation1 + $0x30] sm:$0xff]  ;;  %v228_v49 = vld [vmem:[#allocation1 + $0x38] sm:$0xff] }
  0x18   :  { %227 = vst [vmem:[%s330_s1 + $0x30] sm:$0xff] %v226_v48  ;;  %229 = vst [vmem:[%s330_s1 + $0x38] sm:$0xff] %v228_v49 }

// kernel: resblock_fft_bench.1
= control target key start
LH: loop header
LB: loop body
LE: loop exit
PB: predicated region body
PF: predicated region fallthrough
CT: control target
= control target key end

     0   :  { %s985_s24 = smov 0   ;;  %s987_s25 = smov 0   ;;  %s1047_s0 = inlined_call_operand.vmem [shape: f32[2,4,144], index: 0, kind: input, shape index: {}]   ;;  %s1048_s1 = inlined_call_operand.vmem [shape: f32[2,4,144], index: 1, kind: input, shape index: {}]   ;;  %s1049_s2 = inlined_call_operand.vmem [shape: f32[8,4], index: 2, kind: input, shape index: {}]   ;;  %s1050_s3 = inlined_call_operand.vmem [shape: f32[8,4], index: 3, kind: input, shape index: {}]   ;;  %s1051_s4 = inlined_call_operand.vmem [shape: f32[4,8], index: 4, kind: input, shape index: {}]   ;;  %s1052_s5 = inlined_call_operand.vmem [shape: f32[4,8], index: 5, kind: input, shape index: {}]   ;;  %s1053_s6 = inlined_call_operand.vmem [shape: f32[2,4,144], index: 6, kind: output, shape index: {0}]   ;;  %s1054_s7 = inlined_call_operand.vmem [shape: f32[2,4,144], index: 7, kind: output, shape index: {1}]  }
   0x1   :  { %s989_s26 = smov 0  }
   0x2 LB: > { %s30_s27 = sadd.s32 1, %s938_s25  ;;  %p868_p0 = scmp.ge.s32.totalorder %s942_s26, 1  ;;  %s942_s26 = sphi %s989_s26, %s18_s26   ;;  %s938_s25 = sphi %s987_s25, %s1056_s25   ;;  %s934_s24 = sphi %s985_s24, %s1055_s24  }
   0x3   : > { %p32_p1 = scmp.ge.s32.totalorder %s30_s27, 2  ;;  %p280_p2 = scmp.lt.s32.totalorder %s942_s26, 3 }
   0x5   : > { %s1058_s27 = smov (%p32_p1, %s30_s27), 0  ;;  %p281_p3 = pnand %p868_p0, %p280_p2 }
   0x6   : > { %p339_p4 = scmp.lt.s32.totalorder (!%p281_p3), %s934_s24, 1  ;;  %v944_v0 = vmov (!%p281_p3), 0.0   ;;  %vm388_vm0 = vcmask (!%p281_p3), 1043456   ;;  %v381_v5 = vld [vmem:[%s1050_s3] sm:$0xff] (!%p281_p3)  ;;  %vm384_vm1 = vcmask (!%p281_p3), 31744   ;;  %vm547_vm2 = vcmask (!%p281_p3), 64512  }
   0x7   : > { %284 = sbr.rel (%p281_p3) target bundleno = 467 (0x1d3), region = 44  ;;  %457 = vmatprep.mubr.f32.mxu0 (!%p281_p3), %v944_v0  ;;  %615 = vmatprep.mubr.f32.mxu1 (!%p281_p3), %v944_v0  ;;  %v380_v6 = vld [vmem:[%s1049_s2] sm:$0xff] (!%p281_p3)  ;;  %vm626_vm3 = vcmask (!%p281_p3), 130052  }
   0x8   : > { %v546_v11 = vld [vmem:[%s1051_s4] sm:$0xf] (!%p281_p3)  ;;  %vm627_vm4 = vmor (!%p281_p3), %vm626_vm3, %vm388_vm0 }
   0x9   : > { %v629_v12 = vld [vmem:[%s1052_s5] sm:$0xf] (!%p281_p3) }
   0xe   : > { %s1060_s24 = smov (!%p339_p4, %s934_s24), 1 }
   0xf   : > { %s1003_s28 = sshll.u32 %s1060_s24, 3 }
  0x10   : > { %s356_s8 = scalar_lea.vmem %s1048_s1, %s1003_s28  ;;  %s346_s11 = scalar_lea.vmem %s1047_s0, %s1003_s28 }
  0x11   : > { %v379_v1 = vld [vmem:[%s356_s8] sm:$0xff]  ;;  %s366_s22 = scalar_lea.vmem %s1053_s6, %s1003_s28  ;;  %s376_s29 = scalar_lea.vmem %s1054_s7, %s1003_s28 }
  0x12   : > { %v378_v2 = vld [vmem:[%s346_s11] sm:$0xff]  ;;  %v383_v3 = vcombine.high %v379_v1, %v379_v1 }
  0x13   : > { %v465_v4 = vcombine.high %v378_v2, %v378_v2 }
  0x14   : > { %877 = vmatprep.subr.msk.mxu0 %vm388_vm0, %v383_v3 }
  0x15   : > { %878 = vmatpush1.msk.msra.mxu0 %vm388_vm0, %v379_v1 }
  0x16   : > { %879 = vmatmul.mubr.msk.f32.vlgmr.msra.gmra.mrb[0].mxu0 %vm384_vm1, %v381_v5  ;;  %880 = vmatprep.subr.msk.mxu0 %vm388_vm0, %v465_v4 }
  0x17   : > { %881 = vmatpush1.msk.msra.mxu0 %vm388_vm0, %v378_v2  ;;  %537 = vmatprep.mubr.f32.mxu0 %v944_v0 }
  0x1e   : > { %882 = vmatmul.mubr.msk.f32.vlgmr.msra.gmra.mrb[0].mxu0 %vm384_vm1, %v380_v6 }
  0xf1   : > { %v539_v7 = vpop.f32.mrb[0].mxu0 }
  0xf2   : > { %v541_v8 = vpop.f32.mrb[1].mxu0  ;;  %v544_v10 = vmax.f32 %v539_v7, 0.0 }
  0xf3   : > { %v545_v9 = vmax.f32 %v541_v8, 0.0 }
  0xf5   : > { %551 = vmatprep.subr.mxu1 %v545_v9 }
  0xf6   : > { %552 = vmatpush1.msra.mxu1 %v544_v10 }
  0xf7   : > { %883 = vmatmul.mubr.msk.f32.vlgmr.msra.gmra.mrb[0].mxu1 %vm547_vm2, %v546_v11  ;;  %633 = vmatprep.subr.mxu1 %v545_v9 }
  0xf8   : > { %634 = vmatpush1.msra.mxu1 %v544_v10  ;;  %697 = vmatprep.mubr.f32.mxu1 %v944_v0 }
  0xfb   : > { %884 = vmatmul.mubr.msk.f32.vlgmr.msra.gmra.mrb[2].mxu1 %vm547_vm2, %v629_v12 }
 0x1ca   : > { %v617_v13 = vpop.f32.mrb[0].mxu1 }
 0x1cb   : > { %v619_v14 = vpop.f32.mrb[1].mxu1 }
 0x1cc   : > { %v624_v15 = vcombine.low %v617_v13, %v619_v14 }
 0x1ce   : > { %628 = vst.msk [vmem:[%s366_s22] sm:$0xff] %vm627_vm4, %v624_v15  ;;  %v699_v16 = vpop.f32.mrb[2].mxu1 }
 0x1cf   : > { %v701_v17 = vpop.f32.mrb[3].mxu1 }
 0x1d0   : > { %v706_v18 = vcombine.low %v699_v16, %v701_v17 }
 0x1d2   : > { %708 = vst.msk [vmem:[%s376_s29] sm:$0xff] %vm627_vm4, %v706_v18 }
 0x1d3 PF: > { %s18_s26 = sadd.s32 1, %s942_s26   ;;  %s1055_s24 = smov %s938_s25 }
 0x1d4   : > { %p15_p5 = scmp.ge.s32.totalorder %s18_s26, 4   ;;  %s1056_s25 = smov %s1058_s27 }
 0x1d6   :  { %17 = sbr.rel (!%p15_p5) target bundleno = 2 (0x2), region = 89 }

</bundles_post_ra>
